<compile_context>
chip_gen: v5e
topology: v5e:2x2
jax: 0.10.0
libtpu: 0.0.40
codegen_flags: <defaults>
</compile_context>

<pallas_src>
import jax
import jax.numpy as jnp
from jax.experimental import pallas as pl
from jax.experimental.pallas import tpu as pltpu

C_IN = 56          # fixed by the module definition
C_MID = C_IN // 8  # se_block ratio=8 -> 7
C_MID_PAD = 8      # 7 -> 8 (only the tiny SE bottleneck is padded)
N_OUT = 6
BN_EPS = 1e-5


def net_kernel(x_ref, w1_ref, w2_ref, wc_ref, bc_ref, wl_ref, bl_ref,
               out_ref, q_ref):
    """One batch tile, batch-major: activations are [TILE_B, C]."""
    x = x_ref[...]                                           # [TB, 56] f32
    xb = x.astype(jnp.bfloat16)

    # ---- se_block (H=W=1 so avg-pool == identity) -----------------------
    h = jnp.dot(xb, w1_ref[...],
                preferred_element_type=jnp.float32)          # [TB, 8]
    h = jnp.maximum(h, 0.0)                                  # ReLU (f32 on VPU)
    q = jax.nn.sigmoid(
        jnp.dot(h.astype(jnp.bfloat16), w2_ref[...],
                preferred_element_type=jnp.float32))         # [TB, 56]
    q_ref[...] = q.astype(q_ref.dtype)                       # quanzhong, stored bf16
    y = q * x                                                # SE-scaled input, f32

    # ---- 3 x (Conv3x3-same on 1x1 map + folded BN + ReLU) ---------------
    for l in range(3):                                       # static unroll
        y = (jnp.dot(y.astype(jnp.bfloat16), wc_ref[l],
                     preferred_element_type=jnp.float32)
             + bc_ref[l])                                    # bias [1, 56] broadcasts over rows
        y = jnp.maximum(y, 0.0)

    # ---- head: Dropout(eval) == identity; Linear(56, 6) -----------------
    out = (jnp.dot(y.astype(jnp.bfloat16), wl_ref[...],
                   preferred_element_type=jnp.float32)
           + bl_ref[...])                                    # [TB, 6]
    out_ref[...] = out.astype(out_ref.dtype)


def _round_up(n, m):
    return -(-n // m) * m


def run_net(x_bc, w1, w2, wc, bc, wl, bl, *, tile_b=None):
    """x_bc: [B, 56] f32 (NCHW input with its 1x1 spatial squeezed).
    Returns (logits [B, 6] f32, quanzhong [B, 56] bf16)."""
    B, C = x_bc.shape
    assert C == C_IN

    if tile_b is None:
        tile_b = 2048                        # big tiles amortize per-step overhead; VMEM use stays ~few MiB
    if B <= tile_b:
        # single-tile path for small batches; multiple of 16 keeps the bf16
        # quanzhong store sublane-aligned.
        tile_b = max(16, _round_up(B, 16))
        # keep >= 2 grid steps for moderately large batches so v7x's two
        # TensorCores both get work.
        if tile_b >= 512:
            tile_b = _round_up(tile_b // 2, 16)
    b_pad = _round_up(B, tile_b)
    n_tiles = b_pad // tile_b

    x_p = x_bc.astype(jnp.float32)
    if b_pad != B:                           # only pad the batch remainder (no channel pad, no transpose)
        x_p = jnp.pad(x_p, ((0, b_pad - B), (0, 0)))

    tile_map = lambda i: (i, 0)
    full2 = lambda i: (0, 0)
    full3 = lambda i: (0, 0, 0)

    out_shape = (
        jax.ShapeDtypeStruct((b_pad, N_OUT), jnp.float32),   # logits
        jax.ShapeDtypeStruct((b_pad, C_IN), jnp.bfloat16),   # quanzhong (bf16 halves the write traffic)
    )

    out, q = pl.pallas_call(
        net_kernel,
        grid=(n_tiles,),
        in_specs=[
            pl.BlockSpec((tile_b, C_IN), tile_map),          # x   (blocked over batch)
            pl.BlockSpec((C_IN, C_MID_PAD), full2),          # w1^T (VMEM-resident)
            pl.BlockSpec((C_MID_PAD, C_IN), full2),          # w2^T
            pl.BlockSpec((3, C_IN, C_IN), full3),            # wc^T (BN-folded conv center taps)
            pl.BlockSpec((3, 1, C_IN), full3),               # bc   (BN-folded biases)
            pl.BlockSpec((C_IN, N_OUT), full2),              # wl^T
            pl.BlockSpec((1, N_OUT), full2),                 # bl
        ],
        out_specs=(
            pl.BlockSpec((tile_b, N_OUT), tile_map),         # logits
            pl.BlockSpec((tile_b, C_IN), tile_map),          # quanzhong
        ),
        out_shape=out_shape,
        compiler_params=pltpu.CompilerParams(
            dimension_semantics=("parallel",),
            vmem_limit_bytes=32 * 1024 * 1024),
    )(x_p, w1, w2, wc, bc, wl, bl)

    if b_pad != B:                           # strip batch padding only
        out = out[:B]
        q = q[:B]
    return out, q                            # q is bf16; upcast only if the consumer needs f32


def make_params(key):
    ks = jax.random.split(key, 12)
    p = {}
    # se_block linears (PyTorch Linear weight layout: [out, in], no bias)
    p["fc1_w"] = jax.random.normal(ks[0], (C_MID, C_IN), jnp.float32) * 0.1
    p["fc2_w"] = jax.random.normal(ks[1], (C_IN, C_MID), jnp.float32) * 0.1
    # 3 conv layers: weight [out, in, 3, 3], bias [out]
    p["conv_w"] = jax.random.normal(ks[2], (3, C_IN, C_IN, 3, 3), jnp.float32) * 0.05
    p["conv_b"] = jax.random.normal(ks[3], (3, C_IN), jnp.float32) * 0.05
    # 3 batch-norm layers (eval mode: running stats)
    p["bn_gamma"] = 1.0 + 0.1 * jax.random.normal(ks[4], (3, C_IN), jnp.float32)
    p["bn_beta"] = 0.1 * jax.random.normal(ks[5], (3, C_IN), jnp.float32)
    p["bn_mean"] = 0.1 * jax.random.normal(ks[6], (3, C_IN), jnp.float32)
    p["bn_var"] = 1.0 + jnp.abs(jax.random.normal(ks[7], (3, C_IN), jnp.float32)) * 0.1
    # output Linear(56, 6)
    p["lin_w"] = jax.random.normal(ks[8], (N_OUT, C_IN), jnp.float32) * 0.1
    p["lin_b"] = jax.random.normal(ks[9], (N_OUT,), jnp.float32) * 0.1
    return p


def fold_params(p):
    """Glue (one-off, tiny arrays): fold eval-mode BN into the conv center taps,
    transpose every weight to [in, out] so the kernel computes x @ W in its
    batch-major layout, pad only the 7-wide SE bottleneck to 8, and cast MXU
    operands to bf16 (biases stay f32, pre-shaped for lane-broadcast)."""
    w1 = jnp.pad(p["fc1_w"].T, ((0, 0), (0, C_MID_PAD - C_MID))
                 ).astype(jnp.bfloat16)                                   # [56, 8]
    w2 = jnp.pad(p["fc2_w"].T, ((0, C_MID_PAD - C_MID), (0, 0))
                 ).astype(jnp.bfloat16)                                   # [8, 56]

    center = p["conv_w"][:, :, :, 1, 1]                  # [3, out, in]; only tap that hits a 1x1 map
    scale = p["bn_gamma"] / jnp.sqrt(p["bn_var"] + BN_EPS)                # [3, out]
    w_fold = center * scale[:, :, None]                                   # [3, out, in]
    b_fold = (p["conv_b"] - p["bn_mean"]) * scale + p["bn_beta"]          # [3, out]
    wc = jnp.transpose(w_fold, (0, 2, 1)).astype(jnp.bfloat16)            # [3, 56, 56]  (in, out)
    bc = b_fold.reshape(3, 1, C_IN).astype(jnp.float32)                   # [3, 1, 56]

    wl = p["lin_w"].T.astype(jnp.bfloat16)                                # [56, 6]
    bl = p["lin_b"].reshape(1, N_OUT).astype(jnp.float32)                 # [1, 6]
    return w1, w2, wc, bc, wl, bl


def reference(x_nchw, p):
    """Pure-JAX f32 reference mirroring the PyTorch forward (eval mode)."""
    pooled = jnp.mean(x_nchw, axis=(2, 3))               # AdaptiveAvgPool2d(1)
    h = jnp.maximum(pooled @ p["fc1_w"].T, 0.0)
    q = jax.nn.sigmoid(h @ p["fc2_w"].T)
    y = q * pooled                                       # (q.view(b,c,1,1) * x) squeezed
    center = p["conv_w"][:, :, :, 1, 1]
    scale = p["bn_gamma"] / jnp.sqrt(p["bn_var"] + BN_EPS)
    w_fold = center * scale[:, :, None]
    b_fold = (p["conv_b"] - p["bn_mean"]) * scale + p["bn_beta"]
    for l in range(3):
        y = jnp.maximum(y @ w_fold[l].T + b_fold[l][None, :], 0.0)
    out = y @ p["lin_w"].T + p["lin_b"][None, :]
    return out, q


if __name__ == "__main__":
    key = jax.random.PRNGKey(0)
    kx, kp = jax.random.split(key)

    B = 2
    x = jax.random.normal(kx, (B, C_IN, 1, 1), jnp.float32)   # NCHW, H=W=1

    params = make_params(kp)
    folded = fold_params(params)

    x_bc = x.reshape(B, C_IN)                                 # squeeze 1x1 spatial (glue)
    out, quanzhong = run_net(x_bc, *folded)
    jax.block_until_ready((out, quanzhong))

    ref_out, ref_q = reference(x, params)
    assert out.shape == (B, N_OUT) and quanzhong.shape == (B, C_IN)
    # bf16 MXU inputs + bf16 quanzhong storage -> relaxed tolerances vs f32 reference
    assert jnp.allclose(out, ref_out, atol=2e-2, rtol=2e-2), \
        float(jnp.max(jnp.abs(out - ref_out)))
    q_f32 = quanzhong.astype(jnp.float32)
    assert jnp.allclose(q_f32, ref_q, atol=2e-2, rtol=2e-2), \
        float(jnp.max(jnp.abs(q_f32 - ref_q)))

    # Second check: multi-tile grid path with batch not a multiple of the tile.
    B2 = 300
    x2 = jax.random.normal(jax.random.PRNGKey(1), (B2, C_IN, 1, 1), jnp.float32)
    out2, q2 = run_net(x2.reshape(B2, C_IN), *folded, tile_b=128)
    jax.block_until_ready((out2, q2))
    ref_out2, ref_q2 = reference(x2, params)
    assert jnp.allclose(out2, ref_out2, atol=2e-2, rtol=2e-2)
    assert jnp.allclose(q2.astype(jnp.float32), ref_q2, atol=2e-2, rtol=2e-2)

    print("KERNEL_OK")
</pallas_src>

<mosaic_0001>
module attributes {stable_mosaic.version = 11 : i64} {
  func.func @net_kernel(%arg0: i32, %arg1: memref<16x56xf32, #tpu.memory_space<vmem>>, %arg2: memref<56x8xbf16, #tpu.memory_space<vmem>>, %arg3: memref<8x56xbf16, #tpu.memory_space<vmem>>, %arg4: memref<3x56x56xbf16, #tpu.memory_space<vmem>>, %arg5: memref<3x1x56xf32, #tpu.memory_space<vmem>>, %arg6: memref<56x6xbf16, #tpu.memory_space<vmem>>, %arg7: memref<1x6xf32, #tpu.memory_space<vmem>>, %arg8: memref<16x6xf32, #tpu.memory_space<vmem>>, %arg9: memref<16x56xbf16, #tpu.memory_space<vmem>>) attributes {dimension_semantics = [#tpu.dimension_semantics<parallel>], iteration_bounds = array<i64: 1>, scalar_prefetch = 0 : i64, scratch_operands = 0 : i64, tpu.core_type = #tpu.core_type<tc>, window_params = [{transform_indices = @transform_0, window_bounds = array<i64: 16, 56>}, {pipeline_mode = #tpu.pipeline_mode<synchronous>, transform_indices = @transform_1, window_bounds = array<i64: 56, 8>}, {pipeline_mode = #tpu.pipeline_mode<synchronous>, transform_indices = @transform_2, window_bounds = array<i64: 8, 56>}, {pipeline_mode = #tpu.pipeline_mode<synchronous>, transform_indices = @transform_3, window_bounds = array<i64: 3, 56, 56>}, {pipeline_mode = #tpu.pipeline_mode<synchronous>, transform_indices = @transform_4, window_bounds = array<i64: 3, 1, 56>}, {pipeline_mode = #tpu.pipeline_mode<synchronous>, transform_indices = @transform_5, window_bounds = array<i64: 56, 6>}, {pipeline_mode = #tpu.pipeline_mode<synchronous>, transform_indices = @transform_6, window_bounds = array<i64: 1, 6>}, {transform_indices = @transform_7, window_bounds = array<i64: 16, 6>}, {transform_indices = @transform_8, window_bounds = array<i64: 16, 56>}]} {
    %c0 = arith.constant 0 : index
    %c0_0 = arith.constant 0 : index
    %0 = vector.load %arg1[%c0, %c0_0] : memref<16x56xf32, #tpu.memory_space<vmem>>, vector<16x56xf32>
    %1 = arith.truncf %0 : vector<16x56xf32> to vector<16x56xbf16>
    %c0_1 = arith.constant 0 : index
    %c0_2 = arith.constant 0 : index
    %2 = vector.load %arg2[%c0_1, %c0_2] : memref<56x8xbf16, #tpu.memory_space<vmem>>, vector<56x8xbf16>
    %cst = arith.constant dense<0.000000e+00> : vector<16x8xf32>
    %3 = tpu.matmul %1, %2, %cst {dimension_numbers = #tpu.dot_dimension_numbers<[1], [0], [0], [1], [0, 0, 1, 1], [], []>} : vector<16x56xbf16>, vector<56x8xbf16>, vector<16x8xf32> -> vector<16x8xf32>
    %cst_3 = arith.constant 0.000000e+00 : f32
    %4 = vector.broadcast %cst_3 : f32 to vector<16x8xf32>
    %5 = arith.maximumf %3, %4 : vector<16x8xf32>
    %6 = arith.truncf %5 : vector<16x8xf32> to vector<16x8xbf16>
    %c0_4 = arith.constant 0 : index
    %c0_5 = arith.constant 0 : index
    %7 = vector.load %arg3[%c0_4, %c0_5] : memref<8x56xbf16, #tpu.memory_space<vmem>>, vector<8x56xbf16>
    %cst_6 = arith.constant dense<0.000000e+00> : vector<16x56xf32>
    %8 = tpu.matmul %6, %7, %cst_6 {dimension_numbers = #tpu.dot_dimension_numbers<[1], [0], [0], [1], [0, 0, 1, 1], [], []>} : vector<16x8xbf16>, vector<8x56xbf16>, vector<16x56xf32> -> vector<16x56xf32>
    %9 = arith.negf %8 : vector<16x56xf32>
    %10 = math.exp %9 : vector<16x56xf32>
    %cst_7 = arith.constant 1.000000e+00 : f32
    %11 = vector.broadcast %cst_7 : f32 to vector<16x56xf32>
    %12 = arith.addf %11, %10 : vector<16x56xf32>
    %13 = arith.divf %11, %12 : vector<16x56xf32>
    %14 = arith.truncf %13 : vector<16x56xf32> to vector<16x56xbf16>
    %c0_8 = arith.constant 0 : index
    %c0_9 = arith.constant 0 : index
    %15 = vector.load %arg9[%c0_8, %c0_9] : memref<16x56xbf16, #tpu.memory_space<vmem>>, vector<16x56xbf16>
    tpu.vector_store %arg9[%c0_8, %c0_9], %14 {strides = array<i32>} : memref<16x56xbf16, #tpu.memory_space<vmem>>, vector<16x56xbf16>,
    %16 = arith.mulf %13, %0 : vector<16x56xf32>
    %17 = arith.truncf %16 : vector<16x56xf32> to vector<16x56xbf16>
    %c0_10 = arith.constant 0 : index
    %c0_11 = arith.constant 0 : index
    %c0_12 = arith.constant 0 : index
    %18 = vector.load %arg4[%c0_10, %c0_11, %c0_12] : memref<3x56x56xbf16, #tpu.memory_space<vmem>>, vector<1x56x56xbf16>
    %19 = vector.shape_cast %18 : vector<1x56x56xbf16> to vector<56x56xbf16>
    %cst_13 = arith.constant dense<0.000000e+00> : vector<16x56xf32>
    %20 = tpu.matmul %17, %19, %cst_13 {dimension_numbers = #tpu.dot_dimension_numbers<[1], [0], [0], [1], [0, 0, 1, 1], [], []>} : vector<16x56xbf16>, vector<56x56xbf16>, vector<16x56xf32> -> vector<16x56xf32>
    %c0_14 = arith.constant 0 : index
    %c0_15 = arith.constant 0 : index
    %c0_16 = arith.constant 0 : index
    %21 = vector.load %arg5[%c0_14, %c0_15, %c0_16] : memref<3x1x56xf32, #tpu.memory_space<vmem>>, vector<1x1x56xf32>
    %22 = vector.shape_cast %21 : vector<1x1x56xf32> to vector<1x56xf32>
    %23 = vector.broadcast %22 : vector<1x56xf32> to vector<16x56xf32>
    %24 = arith.addf %20, %23 : vector<16x56xf32>
    %cst_17 = arith.constant 0.000000e+00 : f32
    %25 = vector.broadcast %cst_17 : f32 to vector<16x56xf32>
    %26 = arith.maximumf %24, %25 : vector<16x56xf32>
    %27 = arith.truncf %26 : vector<16x56xf32> to vector<16x56xbf16>
    %c1 = arith.constant 1 : index
    %c0_18 = arith.constant 0 : index
    %c0_19 = arith.constant 0 : index
    %28 = vector.load %arg4[%c1, %c0_18, %c0_19] : memref<3x56x56xbf16, #tpu.memory_space<vmem>>, vector<1x56x56xbf16>
    %29 = vector.shape_cast %28 : vector<1x56x56xbf16> to vector<56x56xbf16>
    %cst_20 = arith.constant dense<0.000000e+00> : vector<16x56xf32>
    %30 = tpu.matmul %27, %29, %cst_20 {dimension_numbers = #tpu.dot_dimension_numbers<[1], [0], [0], [1], [0, 0, 1, 1], [], []>} : vector<16x56xbf16>, vector<56x56xbf16>, vector<16x56xf32> -> vector<16x56xf32>
    %c1_21 = arith.constant 1 : index
    %c0_22 = arith.constant 0 : index
    %c0_23 = arith.constant 0 : index
    %31 = vector.load %arg5[%c1_21, %c0_22, %c0_23] : memref<3x1x56xf32, #tpu.memory_space<vmem>>, vector<1x1x56xf32>
    %32 = vector.shape_cast %31 : vector<1x1x56xf32> to vector<1x56xf32>
    %33 = vector.broadcast %32 : vector<1x56xf32> to vector<16x56xf32>
    %34 = arith.addf %30, %33 : vector<16x56xf32>
    %cst_24 = arith.constant 0.000000e+00 : f32
    %35 = vector.broadcast %cst_24 : f32 to vector<16x56xf32>
    %36 = arith.maximumf %34, %35 : vector<16x56xf32>
    %37 = arith.truncf %36 : vector<16x56xf32> to vector<16x56xbf16>
    %c2 = arith.constant 2 : index
    %c0_25 = arith.constant 0 : index
    %c0_26 = arith.constant 0 : index
    %38 = vector.load %arg4[%c2, %c0_25, %c0_26] : memref<3x56x56xbf16, #tpu.memory_space<vmem>>, vector<1x56x56xbf16>
    %39 = vector.shape_cast %38 : vector<1x56x56xbf16> to vector<56x56xbf16>
    %cst_27 = arith.constant dense<0.000000e+00> : vector<16x56xf32>
    %40 = tpu.matmul %37, %39, %cst_27 {dimension_numbers = #tpu.dot_dimension_numbers<[1], [0], [0], [1], [0, 0, 1, 1], [], []>} : vector<16x56xbf16>, vector<56x56xbf16>, vector<16x56xf32> -> vector<16x56xf32>
    %c2_28 = arith.constant 2 : index
    %c0_29 = arith.constant 0 : index
    %c0_30 = arith.constant 0 : index
    %41 = vector.load %arg5[%c2_28, %c0_29, %c0_30] : memref<3x1x56xf32, #tpu.memory_space<vmem>>, vector<1x1x56xf32>
    %42 = vector.shape_cast %41 : vector<1x1x56xf32> to vector<1x56xf32>
    %43 = vector.broadcast %42 : vector<1x56xf32> to vector<16x56xf32>
    %44 = arith.addf %40, %43 : vector<16x56xf32>
    %cst_31 = arith.constant 0.000000e+00 : f32
    %45 = vector.broadcast %cst_31 : f32 to vector<16x56xf32>
    %46 = arith.maximumf %44, %45 : vector<16x56xf32>
    %47 = arith.truncf %46 : vector<16x56xf32> to vector<16x56xbf16>
    %c0_32 = arith.constant 0 : index
    %c0_33 = arith.constant 0 : index
    %48 = vector.load %arg6[%c0_32, %c0_33] : memref<56x6xbf16, #tpu.memory_space<vmem>>, vector<56x6xbf16>
    %cst_34 = arith.constant dense<0.000000e+00> : vector<16x6xf32>
    %49 = tpu.matmul %47, %48, %cst_34 {dimension_numbers = #tpu.dot_dimension_numbers<[1], [0], [0], [1], [0, 0, 1, 1], [], []>} : vector<16x56xbf16>, vector<56x6xbf16>, vector<16x6xf32> -> vector<16x6xf32>
    %c0_35 = arith.constant 0 : index
    %c0_36 = arith.constant 0 : index
    %50 = vector.load %arg7[%c0_35, %c0_36] : memref<1x6xf32, #tpu.memory_space<vmem>>, vector<1x6xf32>
    %51 = vector.broadcast %50 : vector<1x6xf32> to vector<16x6xf32>
    %52 = arith.addf %49, %51 : vector<16x6xf32>
    %c0_37 = arith.constant 0 : index
    %c0_38 = arith.constant 0 : index
    %53 = vector.load %arg8[%c0_37, %c0_38] : memref<16x6xf32, #tpu.memory_space<vmem>>, vector<16x6xf32>
    tpu.vector_store %arg8[%c0_37, %c0_38], %52 {strides = array<i32>} : memref<16x6xf32, #tpu.memory_space<vmem>>, vector<16x6xf32>,
    return
  }
  func.func @transform_0(%arg0: i32) -> (i32, i32) {
    %c0_i32 = arith.constant 0 : i32
    %c0_i32_0 = arith.constant 0 : i32
    return %arg0, %c0_i32 : i32, i32
  }
  func.func @transform_1(%arg0: i32) -> (i32, i32) {
    %c0_i32 = arith.constant 0 : i32
    %c0_i32_0 = arith.constant 0 : i32
    %c0_i32_1 = arith.constant 0 : i32
    return %c0_i32, %c0_i32_0 : i32, i32
  }
  func.func @transform_2(%arg0: i32) -> (i32, i32) {
    %c0_i32 = arith.constant 0 : i32
    %c0_i32_0 = arith.constant 0 : i32
    %c0_i32_1 = arith.constant 0 : i32
    return %c0_i32, %c0_i32_0 : i32, i32
  }
  func.func @transform_3(%arg0: i32) -> (i32, i32, i32) {
    %c0_i32 = arith.constant 0 : i32
    %c0_i32_0 = arith.constant 0 : i32
    %c0_i32_1 = arith.constant 0 : i32
    %c0_i32_2 = arith.constant 0 : i32
    return %c0_i32, %c0_i32_0, %c0_i32_1 : i32, i32, i32
  }
  func.func @transform_4(%arg0: i32) -> (i32, i32, i32) {
    %c0_i32 = arith.constant 0 : i32
    %c0_i32_0 = arith.constant 0 : i32
    %c0_i32_1 = arith.constant 0 : i32
    %c0_i32_2 = arith.constant 0 : i32
    return %c0_i32, %c0_i32_0, %c0_i32_1 : i32, i32, i32
  }
  func.func @transform_5(%arg0: i32) -> (i32, i32) {
    %c0_i32 = arith.constant 0 : i32
    %c0_i32_0 = arith.constant 0 : i32
    %c0_i32_1 = arith.constant 0 : i32
    return %c0_i32, %c0_i32_0 : i32, i32
  }
  func.func @transform_6(%arg0: i32) -> (i32, i32) {
    %c0_i32 = arith.constant 0 : i32
    %c0_i32_0 = arith.constant 0 : i32
    %c0_i32_1 = arith.constant 0 : i32
    return %c0_i32, %c0_i32_0 : i32, i32
  }
  func.func @transform_7(%arg0: i32) -> (i32, i32) {
    %c0_i32 = arith.constant 0 : i32
    %c0_i32_0 = arith.constant 0 : i32
    return %arg0, %c0_i32 : i32, i32
  }
  func.func @transform_8(%arg0: i32) -> (i32, i32) {
    %c0_i32 = arith.constant 0 : i32
    %c0_i32_0 = arith.constant 0 : i32
    return %arg0, %c0_i32 : i32, i32
  }
}

</mosaic_0001>

<bundles_post_ra>
// kernel: tpu_custom_call.1
= control target key start
LH: loop header
LB: loop body
LE: loop exit
PB: predicated region body
PF: predicated region fallthrough
CT: control target
= control target key end

     0   :  { %14 = vsyncpa [#allocation3], 0  ;;  %s703_s0 = inlined_call_operand.vmem [shape: f32[16,56], index: 0, kind: input, shape index: {}]   ;;  %s704_s1 = inlined_call_operand.vmem [shape: bf16[56,8], index: 1, kind: input, shape index: {}]   ;;  %s705_s2 = inlined_call_operand.vmem [shape: bf16[8,56], index: 2, kind: input, shape index: {}]   ;;  %s706_s3 = inlined_call_operand.hbm [shape: bf16[3,56,56], index: 3, kind: input, shape index: {}]   ;;  %s707_s4 = inlined_call_operand.vmem [shape: f32[3,1,56], index: 4, kind: input, shape index: {}]   ;;  %s708_s5 = inlined_call_operand.vmem [shape: bf16[56,6], index: 5, kind: input, shape index: {}]   ;;  %s709_s6 = inlined_call_operand.vmem [shape: f32[1,6], index: 6, kind: input, shape index: {}]   ;;  %s710_s7 = inlined_call_operand.vmem [shape: f32[16,6], index: 7, kind: output, shape index: {0}]   ;;  %s711_s8 = inlined_call_operand.hbm [shape: bf16[16,56], index: 8, kind: output, shape index: {1}]  }
   0x1   :  { %15 = vsyncpa [#allocation4], 0  ;;  %s26_s29 = sshll.u32 %s706_s3, 4  ;;  %s570_s30 = smov [#allocation2]   ;;  %s27_s29 = int_to_ptr.hbm [resolvable:$true] %s26_s29 }
   0x2   :  { %s28_s9 = sshll.u32 %s570_s30, 4  ;;  %s571_s10 = smov 64   ;;  %s29_s9 = int_to_ptr.vmem [resolvable:$true] %s28_s9 }
   0x3   :  { %s572_s11 = smov 4  }
   0x4   :  { %34 = dma.hbm_to_vmem [thread:$0]  %s27_s29, 1344, %s29_s9, [#allocation3], %s571_s10, %s571_s10, %s572_s11  }
   0x5   :  { %566 = dma.done.wait [#allocation3], 1344  }
   0x6   :  { %567 = vsyncadd [#allocation3], 4294965952  ;;  %v55_v0 = vld [vmem:[%s704_s1 + $0x18] sm:$0xf]  ;;  %vm81_vm0 = vcmask 1043456   ;;  %v489_v4 = vld [vmem:[%s704_s1 + $0x10] sm:$0xff] }
   0x7   :  { %v69_v1 = vunpack.c.l.b16 %v55_v0  ;;  %v488_v5 = vld [vmem:[%s704_s1 + $0x8] sm:$0xff]  ;;  %v487_v6 = vld [vmem:[%s704_s1] sm:$0xff]  ;;  %vm77_vm1 = vcmask 457728   ;;  %vm103_vm2 = vcmask 64512   ;;  %v176_v17 = vld [vmem:[#allocation2 + $0x18] sm:$0xf] }
   0x8   :  { %v641_v7 = vld [vmem:[%s703_s0] sm:$0xff]  ;;  %v646_v8 = vld [vmem:[%s703_s0 + $0x8] sm:$0xff]  ;;  %v194_v18 = vunpack.c.l.b16 %v176_v17  ;;  %v492_v21 = vld [vmem:[#allocation2 + $0x10] sm:$0xff]  ;;  %vm164_vm7 = vcmask 453632   ;;  %s573_s15 = smov [#allocation5]   ;;  %vm391_vm12 = vcmask 48128  }
   0x9   :  { %v73_v2 = vpack.c.b16 %v69_v1, %v69_v1  ;;  %v48_v9 = vpack.c.bf16 %v646_v8, %v641_v7  ;;  %v102_v10 = vld [vmem:[%s705_s2] sm:$0xf]  ;;  %v491_v22 = vld [vmem:[#allocation2 + $0x8] sm:$0xff]  ;;  %v232_v57 = vld [vmem:[#allocation2 + $0x34] sm:$0xf]  ;;  %s400_s16 = sshll.u32 %s573_s15, 4  ;;  %s401_s16 = int_to_ptr.vmem [resolvable:$true] %s400_s16 }
   0xa   :  { %v108_v11 = vsel %vm81_vm0, %v102_v10, 0  ;;  %v198_v19 = vpack.c.b16 %v194_v18, %v194_v18  ;;  %v490_v25 = vld [vmem:[#allocation2] sm:$0xff]  ;;  %v251_v58 = vunpack.c.l.b16 %v232_v57  ;;  %v495_v61 = vld [vmem:[#allocation2 + $0x2c] sm:$0xff] }
   0xb   :  { %v83_v3 = vsel %vm81_vm0, %v73_v2, 0  ;;  %117 = vmatpush.bf16.msra.mxu1 %v108_v11  ;;  %v494_v62 = vld [vmem:[#allocation2 + $0x24] sm:$0xff]  ;;  %v493_v63 = vld [vmem:[#allocation2 + $0x1c] sm:$0xff]  ;;  %v289_v0 = vld [vmem:[#allocation2 + $0x50] sm:$0xf] }
   0xc   :  { %89 = vmatpush.bf16.msra.mxu0 %v83_v3  ;;  %v206_v20 = vsel %vm81_vm0, %v198_v19, 0  ;;  %v255_v59 = vpack.c.b16 %v251_v58, %v251_v58  ;;  %v308_v1 = vunpack.c.l.b16 %v289_v0 }
   0xd   :  { %212 = vmatpush.bf16.msra.mxu2 %v206_v20  ;;  %v507_v20 = vld [vmem:[%s707_s4 + $0x1] ss:$0 sm:$0xff] }
   0xe   :  { %v263_v60 = vsel %vm81_vm0, %v255_v59, 0  ;;  %v312_v2 = vpack.c.b16 %v308_v1, %v308_v1 }
   0xf   :  { %269 = vmatpush.bf16.msra.mxu3 %v263_v60 }
  0x10   :  { %90 = vmatpush.bf16.msra.mxu0 %v489_v4  ;;  %v320_v3 = vsel %vm81_vm0, %v312_v2, 0 }
  0x11   :  { %213 = vmatpush.bf16.msra.mxu2 %v492_v21  ;;  %326 = vmatpush.bf16.msrb.mxu1 %v320_v3 }
  0x13   :  { %270 = vmatpush.bf16.msra.mxu3 %v495_v61 }
  0x14   :  { %91 = vmatpush.bf16.msra.mxu0 %v488_v5  ;;  %v506_v5 = vld [vmem:[%s707_s4] ss:$0 sm:$0xff] }
  0x15   :  { %214 = vmatpush.bf16.msra.mxu2 %v491_v22 }
  0x17   :  { %271 = vmatpush.bf16.msra.mxu3 %v494_v62 }
  0x18   :  { %92 = vmatpush.bf16.msra.mxu0 %v487_v6 }
  0x19   :  { %215 = vmatpush.bf16.msra.mxu2 %v490_v25 }
  0x1b   :  { %429 = vmatmul.msk.bf16.vlgmr.msra.gmra.mxu0 %vm77_vm1, %v48_v9  ;;  %272 = vmatpush.bf16.msra.mxu3 %v493_v63 }
  0x98   :  { %v94_v12 = vpop.f32.mrf.mxu0 }
  0x99   :  { %v99_v14 = vmax.f32 %v94_v12, 0.0  ;;  %v498_v12 = vld [vmem:[#allocation2 + $0x48] sm:$0xff] }
  0x9a   :  { %327 = vmatpush.bf16.msrb.mxu1 %v498_v12 }
  0xa0   :  { %v96_v13 = vpop.f32.mrf.mxu0 }
  0xa1   :  { %v100_v15 = vmax.f32 %v96_v13, 0.0  ;;  %v497_v13 = vld [vmem:[#allocation2 + $0x40] sm:$0xff] }
  0xa2   :  { %328 = vmatpush.bf16.msrb.mxu1 %v497_v13 }
  0xa3   :  { %v101_v16 = vpack.c.bf16 %v100_v15, %v99_v14  ;;  %v496_v14 = vld [vmem:[#allocation2 + $0x38] sm:$0xff] }
  0xa4   :  { %v345_v15 = vld [vmem:[%s708_s5 + $0x18] sm:$0xf] }
  0xa5   :  { %430 = vmatmul.msk.bf16.vlgmr.msra.gmra.mxu1 %vm103_vm2, %v101_v16  ;;  %v363_v16 = vunpack.c.l.b16 %v345_v15 }
  0xa6   :  { %329 = vmatpush.bf16.msrb.mxu1 %v496_v14 }
  0xa7   :  { %v367_v17 = vpack.c.b16 %v363_v16, %v363_v16 }
  0xa9   :  { %v375_v18 = vsel %vm81_vm0, %v367_v17, 0 }
  0xaa   :  { %381 = vmatpush.bf16.msrb.mxu0 %v375_v18 }
 0x122   :  { %v119_v23 = vpop.f32.mrf.mxu1 }
 0x123   :  { %v431_v24 = vmul.f32 -1.442695, %v119_v23 }
 0x125   :  { %510 = vpow2.f32 %v431_v24 }
 0x12a   :  { %v121_v26 = vpop.f32.mrf.mxu1 }
 0x12b   :  { %v511_v27 = vpop.eup %510  ;;  %v432_v28 = vmul.f32 -1.442695, %v121_v26 }
 0x12c   :  { %v130_v29 = vadd.f32 1.0, %v511_v27  ;;  %v501_v27 = vld [vmem:[%s708_s5 + $0x10] sm:$0xff] }
 0x12d   :  { %512 = vpow2.f32 %v432_v28  ;;  %382 = vmatpush.bf16.msrb.mxu0 %v501_v27  ;;  %v500_v28 = vld [vmem:[%s708_s5 + $0x8] sm:$0xff] }
 0x12e   :  { %514 = vrcp.f32 %v130_v29  ;;  %v143_v35 = vand.u32 2147483648, %v130_v29  ;;  %v141_v37 = vand.u32 2147483647, %v130_v29  ;;  %vm137_vm4 = vweird.f32 %v130_v29 }
 0x130   :  { %v144_v40 = vor.u32 1.1754944e-38, %v143_v35  ;;  %vm142_vm6 = vcmp.eq.f32.partialorder %v141_v37, 8.507059e+37 }
 0x131   :  { %383 = vmatpush.bf16.msrb.mxu0 %v500_v28 }
 0x133   :  { %v513_v30 = vpop.eup %512 }
 0x134   :  { %v515_v31 = vpop.eup %514  ;;  %v131_v32 = vadd.f32 1.0, %v513_v30 }
 0x135   :  { %v133_v33 = vmul.f32 %v515_v31, %v130_v29  ;;  %vm138_vm3 = vweird.f32 %v515_v31  ;;  %v499_v29 = vld [vmem:[%s708_s5] sm:$0xff]  ;;  %s402_s5 = sshll.u32 %s711_s8, 4  ;;  %s403_s5 = int_to_ptr.hbm [resolvable:$true] %s402_s5 }
 0x136   :  { %516 = vrcp.f32 %v131_v32  ;;  %vm139_vm5 = vmor %vm137_vm4, %vm138_vm3  ;;  %v158_v46 = vand.u32 2147483648, %v131_v32  ;;  %v156_v48 = vand.u32 2147483647, %v131_v32  ;;  %vm152_vm9 = vweird.f32 %v131_v32  ;;  %384 = vmatpush.bf16.msrb.mxu0 %v499_v29 }
 0x137   :  { %v134_v34 = vsub.f32 1.0, %v133_v33 }
 0x138   :  { %v159_v50 = vor.u32 1.1754944e-38, %v158_v46  ;;  %vm157_vm11 = vcmp.eq.f32.partialorder %v156_v48, 8.507059e+37 }
 0x139   :  { %v135_v36 = vmul.f32 %v515_v31, %v134_v34 }
 0x13b   :  { %v136_v38 = vadd.f32 %v515_v31, %v135_v36 }
 0x13c   :  { %v517_v39 = vpop.eup %516 }
 0x13d   :  { %v148_v41 = vmul.f32 %v517_v39, %v131_v32  ;;  %v140_v42 = vsel %vm139_vm5, %v515_v31, %v136_v38  ;;  %vm153_vm8 = vweird.f32 %v517_v39  ;;  %v508_v31 = vld [vmem:[%s707_s4 + $0x2] ss:$0 sm:$0xff]  ;;  %v509_v38 = vld [vmem:[%s709_s6] ss:$0 sm:$0xff] }
 0x13e   :  { %v145_v43 = vsel %vm142_vm6, %v144_v40, %v140_v42  ;;  %vm154_vm10 = vmor %vm152_vm9, %vm153_vm8 }
 0x13f   :  { %v149_v44 = vsub.f32 1.0, %v148_v41  ;;  %v162_v45 = vpack.c.bf16 %v145_v43, %v145_v43  ;;  %v167_v54 = vmul.f32 %v145_v43, %v641_v7 }
 0x141   :  { %v150_v47 = vmul.f32 %v517_v39, %v149_v44  ;;  %165 = vst.msk [vmem:[#allocation5] sm:$0xf] %vm164_vm7, %v162_v45 }
 0x143   :  { %v151_v49 = vadd.f32 %v517_v39, %v150_v47 }
 0x145   :  { %v155_v51 = vsel %vm154_vm10, %v517_v39, %v151_v49 }
 0x146   :  { %v160_v52 = vsel %vm157_vm11, %v159_v50, %v155_v51 }
 0x147   :  { %v163_v53 = vpack.c.bf16 %v160_v52, %v160_v52  ;;  %v168_v55 = vmul.f32 %v160_v52, %v646_v8 }
 0x149   :  { %v169_v56 = vpack.c.bf16 %v168_v55, %v167_v54  ;;  %166 = vst.msk [vmem:[#allocation5 + $0x4] sm:$0xf] %vm164_vm7, %v163_v53 }
 0x14a   :  { %408 = dma.vmem_to_hbm [thread:$0]  %s401_s16, 128, %s403_s5, [#allocation4], %s571_s10, %s571_s10, %s572_s11  }
 0x14b   :  { %445 = vmatmul.msk.bf16.vlgmr.msra.gmra.mxu2 %vm77_vm1, %v169_v56 }
 0x1ce   :  { %v217_v4 = vpop.f32.mrf.mxu2 }
 0x1cf   :  { %v218_v6 = vadd.f32 %v506_v5, %v217_v4 }
 0x1d1   :  { %v222_v9 = vmax.f32 %v218_v6, 0.0 }
 0x1d6   :  { %v219_v7 = vpop.f32.mrf.mxu2 }
 0x1d7   :  { %v220_v8 = vadd.f32 %v506_v5, %v219_v7 }
 0x1d9   :  { %v223_v10 = vmax.f32 %v220_v8, 0.0 }
 0x1db   :  { %v224_v11 = vpack.c.bf16 %v223_v10, %v222_v9 }
 0x1dd   :  { %459 = vmatmul.msk.bf16.vlgmr.msra.gmra.mxu3 %vm77_vm1, %v224_v11 }
 0x260   :  { %v274_v19 = vpop.f32.mrf.mxu3 }
 0x261   :  { %v275_v21 = vadd.f32 %v507_v20, %v274_v19 }
 0x263   :  { %v279_v24 = vmax.f32 %v275_v21, 0.0 }
 0x268   :  { %v276_v22 = vpop.f32.mrf.mxu3 }
 0x269   :  { %v277_v23 = vadd.f32 %v507_v20, %v276_v22 }
 0x26b   :  { %v280_v25 = vmax.f32 %v277_v23, 0.0 }
 0x26d   :  { %v281_v26 = vpack.c.bf16 %v280_v25, %v279_v24 }
 0x26f   :  { %473 = vmatmul.msk.bf16.vlgmr.msrb.gmra.mxu1 %vm77_vm1, %v281_v26 }
 0x2ec   :  { %v331_v30 = vpop.f32.mrf.mxu1 }
 0x2ed   :  { %v332_v32 = vadd.f32 %v508_v31, %v331_v30 }
 0x2ef   :  { %v336_v35 = vmax.f32 %v332_v32, 0.0 }
 0x2f4   :  { %v333_v33 = vpop.f32.mrf.mxu1 }
 0x2f5   :  { %v334_v34 = vadd.f32 %v508_v31, %v333_v33 }
 0x2f7   :  { %v337_v36 = vmax.f32 %v334_v34, 0.0 }
 0x2f9   :  { %v338_v37 = vpack.c.bf16 %v337_v36, %v336_v35 }
 0x2fb   :  { %486 = vmatmul.msk.bf16.vlgmr.msrb.gmra.mxu0 %vm77_vm1, %v338_v37 }
 0x378   :  { %v386_v39 = vpop.f32.mrf.mxu0 }
 0x379   :  { %v387_v40 = vadd.f32 %v509_v38, %v386_v39 }
 0x37b   :  { %392 = vst.msk [vmem:[%s710_s7] sm:$0xff] %vm391_vm12, %v387_v40 }
 0x380   :  { %v388_v41 = vpop.f32.mrf.mxu0 }
 0x381   :  { %v389_v42 = vadd.f32 %v509_v38, %v388_v41 }
 0x383   :  { %393 = vst.msk [vmem:[%s710_s7 + $0x8] sm:$0xff] %vm391_vm12, %v389_v42 }
 0x384   :  { %568 = dma.done.wait [#allocation4], 128  }
 0x385   :  { %569 = vsyncadd [#allocation4], 4294967168 }
 0x386   :  { %415 = vsyncpa [#allocation3], 1 }
 0x387   :  { %416 = vsyncpa [#allocation4], 1 }

</bundles_post_ra>
